<compile_context>
chip_gen: v7x
topology: tpu7x:2x2x1
jax: 0.10.0
libtpu: 0.0.40
codegen_flags: <defaults>
</compile_context>

<pallas_src>
import jax
import jax.numpy as jnp
from jax import lax
from jax.experimental import pallas as pl
from jax.experimental.pallas import tpu as pltpu


def _round_up(x, m):
    return ((x + m - 1) // m) * m


def _mlp_kernel(x_ref,
                w1_ref, b1_ref,
                w2_ref, b2_ref,
                w3_ref, b3_ref,
                w4_ref, b4_ref,
                o_ref):
    # Layers 1-3: bf16 MXU matmuls with f32 accumulation; bias + ReLU in f32.
    x = x_ref[...].astype(jnp.bfloat16)            # no-op if x already bf16
    h = jnp.dot(x, w1_ref[...], preferred_element_type=jnp.float32)
    h = jnp.maximum(h + b1_ref[...], 0.0)
    h = jnp.dot(h.astype(jnp.bfloat16), w2_ref[...],
                preferred_element_type=jnp.float32)
    h = jnp.maximum(h + b2_ref[...], 0.0)
    h = jnp.dot(h.astype(jnp.bfloat16), w3_ref[...],
                preferred_element_type=jnp.float32)
    h = jnp.maximum(h + b3_ref[...], 0.0)          # (tile_b, 128) f32

    # Layer 4 (out_features == 1): single MXU contraction
    #   (1,128) . (tile_b,128)^T -> (1, tile_b)
    # Produces the lane-dense output row directly; no (tile_b,128) XLU
    # transpose and no masked column stores.
    logit = lax.dot_general(w4_ref[...], h.astype(jnp.bfloat16),
                            (((1,), (1,)), ((), ())),
                            preferred_element_type=jnp.float32)   # (1, tile_b)
    logit = logit + b4_ref[...]                                   # (1,1) bcast
    o_ref[...] = jax.nn.sigmoid(logit).astype(o_ref.dtype)


def _num_tensorcores():
    """2 for multi-TensorCore parts (v7x, v4 megacore), else 1."""
    try:
        kind = jax.devices()[0].device_kind.lower().replace(" ", "")
    except Exception:
        return 1
    return 2 if ("v7" in kind or "tpu7" in kind or "v4" in kind) else 1


def _choose_tile_b(batch, d_lanes, x_itemsize, *, requested=None, num_cores=1,
                   vmem_budget_bytes=24 * 1024 * 1024):
    """Batch tile: as large as possible (target 2048 rows), capped so the
    double-buffered x tile + f32 activation temps fit a conservative VMEM
    budget (safe on v7x's 64 MiB/TC).  Only 2-TC parts keep >= 2 grid steps
    for large batches; single-TC v5e/v6e run one fat step when possible."""
    # sub-32-bit x packs more rows per sublane tile
    row_align = 8 if x_itemsize >= 4 else (32 // x_itemsize)
    if batch < row_align:
        return max(int(batch), 1)            # block == full dim -> exempt

    per_row = (2 * x_itemsize * d_lanes                 # x double buffer
               + 4 * (512 + 256 + 128 + 128)            # f32 activation temps
               + 8)                                     # output row
    cap = max(row_align, vmem_budget_bytes // per_row)

    tile = 2048 if requested is None else requested
    tile = min(tile, cap)
    if num_cores >= 2 and batch >= 2 * 128:
        # keep >= num_cores grid steps so every TensorCore gets work
        tile = min(tile, max(128, (pl.cdiv(batch, num_cores) // 128) * 128))
    tile = min(tile, batch)

    if tile == batch and batch % row_align == 0:
        pass                                  # single exact step
    elif tile >= 128:
        tile = (tile // 128) * 128
    else:
        tile = (tile // row_align) * row_align
    return int(tile)


def _vmem_limit_bytes(D, d_lanes, tile_b, x_itemsize):
    """Actual buffer footprint with ~2x slack, clamped to [32, 56] MiB."""
    weights = (2 * (D * 512 + 512 * 256 + 256 * 128 + 128)   # bf16 weights
               + 4 * (512 + 256 + 128 + 1))                  # f32 biases
    bufs = (2 * weights                                      # double-buffered
            + 2 * tile_b * d_lanes * x_itemsize              # x double buffer
            + 2 * tile_b * 4                                 # output rows
            + 4 * tile_b * (512 + 256 + 128 + 128))          # f32 temps
    return int(min(56 * 1024 * 1024, max(32 * 1024 * 1024, 2 * bufs)))


def epss_predictor(x, params, *, tile_b=None):
    """x: [B, D] float32 or bfloat16.  Returns [B] float32 (sigmoid output)."""
    (w1, b1), (w2, b2), (w3, b3), (w4, b4) = params
    B, D = x.shape
    d_lanes = _round_up(max(D, 1), 128)          # internal lane width of x tile
    x_itemsize = jnp.dtype(x.dtype).itemsize
    tb = _choose_tile_b(B, d_lanes, x_itemsize,
                        requested=tile_b, num_cores=_num_tensorcores())
    num_tiles = pl.cdiv(B, tb)
    out_w = num_tiles * tb                       # lane-dense, always full blocks

    def resident(shape):                         # small array, never re-fetched
        return pl.BlockSpec(shape, lambda i: (0,) * len(shape))

    out = pl.pallas_call(
        _mlp_kernel,
        out_shape=jax.ShapeDtypeStruct((1, out_w), jnp.float32),
        grid_spec=pltpu.PrefetchScalarGridSpec(
            num_scalar_prefetch=0,
            grid=(num_tiles,),
            in_specs=[
                pl.BlockSpec((tb, D), lambda i: (i, 0)),     # x tile, unpadded D
                resident(w1.shape), resident(b1.shape),
                resident(w2.shape), resident(b2.shape),
                resident(w3.shape), resident(b3.shape),
                resident(w4.shape), resident(b4.shape),
            ],
            out_specs=pl.BlockSpec((1, tb), lambda i: (0, i)),  # lane-dense row
        ),
        compiler_params=pltpu.CompilerParams(
            dimension_semantics=("parallel",),
            vmem_limit_bytes=_vmem_limit_bytes(D, d_lanes, tb, x_itemsize),
        ),
    )(x, w1, b1, w2, b2, w3, b3, w4, b4)

    return out[0, :B]    # drops ragged-tail garbage; .squeeze(-1) from PyTorch


def init_params(key, input_dim):
    """Matches EPSSPredictor.init_weights: N(0, 0.02) weights, zero biases.
    Layer 1-3 weights stored transposed as (in, out) bf16 for the MXU; the
    final layer weight is a (1, 128) bf16 row."""
    dims = [(input_dim, 512), (512, 256), (256, 128)]
    params = []
    for din, dout in dims:
        key, sub = jax.random.split(key)
        w = (jax.random.normal(sub, (din, dout), dtype=jnp.float32)
             * 0.02).astype(jnp.bfloat16)
        params.append((w, jnp.zeros((1, dout), jnp.float32)))
    key, sub = jax.random.split(key)
    w4 = (jax.random.normal(sub, (1, 128), dtype=jnp.float32)
          * 0.02).astype(jnp.bfloat16)
    params.append((w4, jnp.zeros((1, 1), jnp.float32)))
    return params


def epss_predictor_ref_f32(x, params):
    """Pure-JAX f32 reference of the PyTorch forward (weights upcast)."""
    (w1, b1), (w2, b2), (w3, b3), (w4, b4) = params
    x = x.astype(jnp.float32)
    h = jax.nn.relu(x @ w1.astype(jnp.float32) + b1)
    h = jax.nn.relu(h @ w2.astype(jnp.float32) + b2)
    h = jax.nn.relu(h @ w3.astype(jnp.float32) + b3)
    return jax.nn.sigmoid(h @ w4.astype(jnp.float32).T + b4)[:, 0]


def epss_predictor_ref_mixed(x, params):
    """Reference mirroring the kernel's bf16-matmul / f32-accumulate path."""
    (w1, b1), (w2, b2), (w3, b3), (w4, b4) = params
    h = jnp.dot(x.astype(jnp.bfloat16), w1, preferred_element_type=jnp.float32)
    h = jnp.maximum(h + b1, 0.0)
    h = jnp.dot(h.astype(jnp.bfloat16), w2, preferred_element_type=jnp.float32)
    h = jnp.maximum(h + b2, 0.0)
    h = jnp.dot(h.astype(jnp.bfloat16), w3, preferred_element_type=jnp.float32)
    h = jnp.maximum(h + b3, 0.0)
    logit = lax.dot_general(h.astype(jnp.bfloat16), w4,
                            (((1,), (1,)), ((), ())),
                            preferred_element_type=jnp.float32)[:, 0] + b4[0, 0]
    return jax.nn.sigmoid(logit)


if __name__ == "__main__":
    key = jax.random.PRNGKey(0)

    # Small config consistent with the module: batch=8, input_dim=32.
    key, kx = jax.random.split(key)
    B, D = 8, 32
    x = jax.random.normal(kx, (B, D), dtype=jnp.float32)
    params = init_params(key, D)
    out = jax.block_until_ready(epss_predictor(x, params))
    assert out.shape == (B,)
    assert jnp.allclose(out, epss_predictor_ref_mixed(x, params), atol=1e-3), \
        "mismatch vs bf16-mirrored reference (small)"
    assert jnp.allclose(out, epss_predictor_ref_f32(x, params), atol=2e-2), \
        "mismatch vs f32 reference (small)"

    # Larger config: ragged batch (tile does not divide 300), non-128 feature
    # dim read with full-D blocks (no padding pass), multi-step parallel grid.
    key, kx2, kp2 = jax.random.split(key, 3)
    B2, D2 = 300, 200
    x2 = jax.random.normal(kx2, (B2, D2), dtype=jnp.float32)
    params2 = init_params(kp2, D2)
    out2 = jax.block_until_ready(epss_predictor(x2, params2))
    assert out2.shape == (B2,)
    assert jnp.allclose(out2, epss_predictor_ref_mixed(x2, params2), atol=1e-3), \
        "mismatch vs bf16-mirrored reference (large)"
    assert jnp.allclose(out2, epss_predictor_ref_f32(x2, params2), atol=2e-2), \
        "mismatch vs f32 reference (large)"

    # bf16-x fast path (halved x DMA); identical operands to the mixed ref.
    out2_bf16 = jax.block_until_ready(
        epss_predictor(x2.astype(jnp.bfloat16), params2))
    assert jnp.allclose(out2_bf16, epss_predictor_ref_mixed(x2, params2),
                        atol=1e-3), "mismatch vs mixed reference (bf16 x)"

    print("KERNEL_OK")
</pallas_src>

<mosaic_0001>
module attributes {stable_mosaic.version = 11 : i64} {
  func.func @_mlp_kernel(%arg0: i32, %arg1: memref<8x32xf32, #tpu.memory_space<vmem>>, %arg2: memref<32x512xbf16, #tpu.memory_space<vmem>>, %arg3: memref<1x512xf32, #tpu.memory_space<vmem>>, %arg4: memref<512x256xbf16, #tpu.memory_space<vmem>>, %arg5: memref<1x256xf32, #tpu.memory_space<vmem>>, %arg6: memref<256x128xbf16, #tpu.memory_space<vmem>>, %arg7: memref<1x128xf32, #tpu.memory_space<vmem>>, %arg8: memref<1x128xbf16, #tpu.memory_space<vmem>>, %arg9: memref<1x1xf32, #tpu.memory_space<vmem>>, %arg10: memref<1x8xf32, #tpu.memory_space<vmem>>) attributes {dimension_semantics = [#tpu.dimension_semantics<parallel>], iteration_bounds = array<i64: 1>, scalar_prefetch = 0 : i64, scratch_operands = 0 : i64, tpu.core_type = #tpu.core_type<tc>, window_params = [{transform_indices = @transform_0, window_bounds = array<i64: 8, 32>}, {pipeline_mode = #tpu.pipeline_mode<synchronous>, transform_indices = @transform_1, window_bounds = array<i64: 32, 512>}, {pipeline_mode = #tpu.pipeline_mode<synchronous>, transform_indices = @transform_2, window_bounds = array<i64: 1, 512>}, {pipeline_mode = #tpu.pipeline_mode<synchronous>, transform_indices = @transform_3, window_bounds = array<i64: 512, 256>}, {pipeline_mode = #tpu.pipeline_mode<synchronous>, transform_indices = @transform_4, window_bounds = array<i64: 1, 256>}, {pipeline_mode = #tpu.pipeline_mode<synchronous>, transform_indices = @transform_5, window_bounds = array<i64: 256, 128>}, {pipeline_mode = #tpu.pipeline_mode<synchronous>, transform_indices = @transform_6, window_bounds = array<i64: 1, 128>}, {pipeline_mode = #tpu.pipeline_mode<synchronous>, transform_indices = @transform_7, window_bounds = array<i64: 1, 128>}, {pipeline_mode = #tpu.pipeline_mode<synchronous>, transform_indices = @transform_8, window_bounds = array<i64: 1, 1>}, {transform_indices = @transform_9, window_bounds = array<i64: 1, 8>}]} {
    %c0 = arith.constant 0 : index
    %c0_0 = arith.constant 0 : index
    %0 = vector.load %arg1[%c0, %c0_0] : memref<8x32xf32, #tpu.memory_space<vmem>>, vector<8x32xf32>
    %1 = arith.truncf %0 : vector<8x32xf32> to vector<8x32xbf16>
    %c0_1 = arith.constant 0 : index
    %c0_2 = arith.constant 0 : index
    %2 = vector.load %arg2[%c0_1, %c0_2] : memref<32x512xbf16, #tpu.memory_space<vmem>>, vector<32x512xbf16>
    %cst = arith.constant dense<0.000000e+00> : vector<8x512xf32>
    %3 = tpu.matmul %1, %2, %cst {dimension_numbers = #tpu.dot_dimension_numbers<[1], [0], [0], [1], [0, 0, 1, 1], [], []>} : vector<8x32xbf16>, vector<32x512xbf16>, vector<8x512xf32> -> vector<8x512xf32>
    %c0_3 = arith.constant 0 : index
    %c0_4 = arith.constant 0 : index
    %4 = vector.load %arg3[%c0_3, %c0_4] : memref<1x512xf32, #tpu.memory_space<vmem>>, vector<1x512xf32>
    %5 = vector.broadcast %4 : vector<1x512xf32> to vector<8x512xf32>
    %6 = arith.addf %3, %5 : vector<8x512xf32>
    %cst_5 = arith.constant 0.000000e+00 : f32
    %7 = vector.broadcast %cst_5 : f32 to vector<8x512xf32>
    %8 = arith.maximumf %6, %7 : vector<8x512xf32>
    %9 = arith.truncf %8 : vector<8x512xf32> to vector<8x512xbf16>
    %c0_6 = arith.constant 0 : index
    %c0_7 = arith.constant 0 : index
    %10 = vector.load %arg4[%c0_6, %c0_7] : memref<512x256xbf16, #tpu.memory_space<vmem>>, vector<512x256xbf16>
    %cst_8 = arith.constant dense<0.000000e+00> : vector<8x256xf32>
    %11 = tpu.matmul %9, %10, %cst_8 {dimension_numbers = #tpu.dot_dimension_numbers<[1], [0], [0], [1], [0, 0, 1, 1], [], []>} : vector<8x512xbf16>, vector<512x256xbf16>, vector<8x256xf32> -> vector<8x256xf32>
    %c0_9 = arith.constant 0 : index
    %c0_10 = arith.constant 0 : index
    %12 = vector.load %arg5[%c0_9, %c0_10] : memref<1x256xf32, #tpu.memory_space<vmem>>, vector<1x256xf32>
    %13 = vector.broadcast %12 : vector<1x256xf32> to vector<8x256xf32>
    %14 = arith.addf %11, %13 : vector<8x256xf32>
    %cst_11 = arith.constant 0.000000e+00 : f32
    %15 = vector.broadcast %cst_11 : f32 to vector<8x256xf32>
    %16 = arith.maximumf %14, %15 : vector<8x256xf32>
    %17 = arith.truncf %16 : vector<8x256xf32> to vector<8x256xbf16>
    %c0_12 = arith.constant 0 : index
    %c0_13 = arith.constant 0 : index
    %18 = vector.load %arg6[%c0_12, %c0_13] : memref<256x128xbf16, #tpu.memory_space<vmem>>, vector<256x128xbf16>
    %cst_14 = arith.constant dense<0.000000e+00> : vector<8x128xf32>
    %19 = tpu.matmul %17, %18, %cst_14 {dimension_numbers = #tpu.dot_dimension_numbers<[1], [0], [0], [1], [0, 0, 1, 1], [], []>} : vector<8x256xbf16>, vector<256x128xbf16>, vector<8x128xf32> -> vector<8x128xf32>
    %c0_15 = arith.constant 0 : index
    %c0_16 = arith.constant 0 : index
    %20 = vector.load %arg7[%c0_15, %c0_16] : memref<1x128xf32, #tpu.memory_space<vmem>>, vector<1x128xf32>
    %21 = vector.broadcast %20 : vector<1x128xf32> to vector<8x128xf32>
    %22 = arith.addf %19, %21 : vector<8x128xf32>
    %cst_17 = arith.constant 0.000000e+00 : f32
    %23 = vector.broadcast %cst_17 : f32 to vector<8x128xf32>
    %24 = arith.maximumf %22, %23 : vector<8x128xf32>
    %c0_18 = arith.constant 0 : index
    %c0_19 = arith.constant 0 : index
    %25 = vector.load %arg8[%c0_18, %c0_19] : memref<1x128xbf16, #tpu.memory_space<vmem>>, vector<1x128xbf16>
    %26 = arith.truncf %24 : vector<8x128xf32> to vector<8x128xbf16>
    %cst_20 = arith.constant dense<0.000000e+00> : vector<1x8xf32>
    %27 = tpu.matmul %25, %26, %cst_20 {dimension_numbers = #tpu.dot_dimension_numbers<[1], [1], [0], [0], [0, 0, 1, 0], [], []>} : vector<1x128xbf16>, vector<8x128xbf16>, vector<1x8xf32> -> vector<1x8xf32>
    %c0_21 = arith.constant 0 : index
    %c0_22 = arith.constant 0 : index
    %28 = vector.load %arg9[%c0_21, %c0_22] : memref<1x1xf32, #tpu.memory_space<vmem>>, vector<1x1xf32>
    %29 = vector.broadcast %28 : vector<1x1xf32> to vector<1x8xf32>
    %30 = arith.addf %27, %29 : vector<1x8xf32>
    %31 = arith.negf %30 : vector<1x8xf32>
    %32 = math.exp %31 : vector<1x8xf32>
    %cst_23 = arith.constant 1.000000e+00 : f32
    %33 = vector.broadcast %cst_23 : f32 to vector<1x8xf32>
    %34 = arith.addf %33, %32 : vector<1x8xf32>
    %35 = arith.divf %33, %34 : vector<1x8xf32>
    %c0_24 = arith.constant 0 : index
    %c0_25 = arith.constant 0 : index
    %36 = vector.load %arg10[%c0_24, %c0_25] : memref<1x8xf32, #tpu.memory_space<vmem>>, vector<1x8xf32>
    tpu.vector_store %arg10[%c0_24, %c0_25], %35 {strides = array<i32>} : memref<1x8xf32, #tpu.memory_space<vmem>>, vector<1x8xf32>,
    return
  }
  func.func @transform_0(%arg0: i32) -> (i32, i32) {
    %c0_i32 = arith.constant 0 : i32
    %c0_i32_0 = arith.constant 0 : i32
    return %arg0, %c0_i32 : i32, i32
  }
  func.func @transform_1(%arg0: i32) -> (i32, i32) {
    %c0_i32 = arith.constant 0 : i32
    %c0_i32_0 = arith.constant 0 : i32
    %c0_i32_1 = arith.constant 0 : i32
    return %c0_i32, %c0_i32_0 : i32, i32
  }
  func.func @transform_2(%arg0: i32) -> (i32, i32) {
    %c0_i32 = arith.constant 0 : i32
    %c0_i32_0 = arith.constant 0 : i32
    %c0_i32_1 = arith.constant 0 : i32
    return %c0_i32, %c0_i32_0 : i32, i32
  }
  func.func @transform_3(%arg0: i32) -> (i32, i32) {
    %c0_i32 = arith.constant 0 : i32
    %c0_i32_0 = arith.constant 0 : i32
    %c0_i32_1 = arith.constant 0 : i32
    return %c0_i32, %c0_i32_0 : i32, i32
  }
  func.func @transform_4(%arg0: i32) -> (i32, i32) {
    %c0_i32 = arith.constant 0 : i32
    %c0_i32_0 = arith.constant 0 : i32
    %c0_i32_1 = arith.constant 0 : i32
    return %c0_i32, %c0_i32_0 : i32, i32
  }
  func.func @transform_5(%arg0: i32) -> (i32, i32) {
    %c0_i32 = arith.constant 0 : i32
    %c0_i32_0 = arith.constant 0 : i32
    %c0_i32_1 = arith.constant 0 : i32
    return %c0_i32, %c0_i32_0 : i32, i32
  }
  func.func @transform_6(%arg0: i32) -> (i32, i32) {
    %c0_i32 = arith.constant 0 : i32
    %c0_i32_0 = arith.constant 0 : i32
    %c0_i32_1 = arith.constant 0 : i32
    return %c0_i32, %c0_i32_0 : i32, i32
  }
  func.func @transform_7(%arg0: i32) -> (i32, i32) {
    %c0_i32 = arith.constant 0 : i32
    %c0_i32_0 = arith.constant 0 : i32
    %c0_i32_1 = arith.constant 0 : i32
    return %c0_i32, %c0_i32_0 : i32, i32
  }
  func.func @transform_8(%arg0: i32) -> (i32, i32) {
    %c0_i32 = arith.constant 0 : i32
    %c0_i32_0 = arith.constant 0 : i32
    %c0_i32_1 = arith.constant 0 : i32
    return %c0_i32, %c0_i32_0 : i32, i32
  }
  func.func @transform_9(%arg0: i32) -> (i32, i32) {
    %c0_i32 = arith.constant 0 : i32
    %c0_i32_0 = arith.constant 0 : i32
    return %c0_i32, %arg0 : i32, i32
  }
}

</mosaic_0001>

<bundles_post_ra>
// kernel: tpu_custom_call.1
= control target key start
LH: loop header
LB: loop body
LE: loop exit
PB: predicated region body
PF: predicated region fallthrough
CT: control target
= control target key end

     0   :  { %s1533_s0 = inlined_call_operand.hbm [shape: f32[8,32], index: 0, kind: input, shape index: {}]   ;;  %s1534_s1 = inlined_call_operand.hbm [shape: bf16[32,512], index: 1, kind: input, shape index: {}]   ;;  %s1535_s2 = inlined_call_operand.vmem [shape: f32[1,512], index: 2, kind: input, shape index: {}]   ;;  %s1536_s3 = inlined_call_operand.hbm [shape: bf16[512,256], index: 3, kind: input, shape index: {}]   ;;  %s1537_s4 = inlined_call_operand.vmem [shape: f32[1,256], index: 4, kind: input, shape index: {}]   ;;  %s1538_s5 = inlined_call_operand.hbm [shape: bf16[256,128], index: 5, kind: input, shape index: {}]   ;;  %s1539_s6 = inlined_call_operand.vmem [shape: f32[1,128], index: 6, kind: input, shape index: {}]   ;;  %s1540_s7 = inlined_call_operand.vmem [shape: bf16[1,128], index: 7, kind: input, shape index: {}]   ;;  %s1541_s8 = inlined_call_operand.<no memory space> [shape: f32[1,1], index: 8, kind: input, shape index: {}]   ;;  %s1542_s9 = inlined_call_operand.hbm [shape: f32[1,8], index: 9, kind: output, shape index: {}]  }
   0x1   :  { %v14_v0 = vstv %s1541_s8 }
   0x2   :  { %15 = vst [vmem:[#allocation2] sm:$0x1] %v14_v0 }
   0x3   :  { %16 = vsyncpa [#allocation4], 0 }
   0x4   :  { %17 = vsyncpa [#allocation7], 0 }
   0x5   :  { %18 = vsyncpa [#allocation10], 0 }
   0x6   :  { %19 = vsyncpa [#allocation5], 0  ;;  %s1377_s11 = smov [#allocation6]   ;;  %s1259_s15 = scalar_lea.hbm %s1534_s1, 1024 }
   0x7   :  { %s35_s12 = sshll.u32 %s1377_s11, 4  ;;  %p1260_p0 = scmp.ne.s32.totalorder %s1534_s1, %s1259_s15  ;;  %s36_s12 = int_to_ptr.vmem [resolvable:$true] %s35_s12 }
   0x8   :  { %p1263_p1 = scmp.lt.u32.totalorder %s1259_s15, %s1534_s1 }
   0xa   :  { %p1265_p2 = pnand %p1263_p1, %p1260_p0 }
   0xc   :  { %1268 = shalt.err (!%p1265_p2)
}
   0xd   :  { %s1269_s8 = scalar_lea.vmem %s36_s12, 1024  ;;  %p1274_p4 = scmp.lt.s32.totalorder %s36_s12, %s36_s12 }
   0xe   :  { %p1270_p3 = scmp.ne.s32.totalorder %s36_s12, %s1269_s8  ;;  %p1275_p5 = scmp.lt.s32.totalorder %s1269_s8, %s1269_s8 }
  0x10   :  { %p1276_p6 = por %p1275_p5, %p1274_p4 }
  0x12   :  { %p1277_p7 = pnand %p1276_p6, %p1270_p3 }
  0x14   :  { %1280 = shalt.err (!%p1277_p7)
}
  0x15   :  { %s1378_s20 = smov 256   ;;  %s1379_s21 = smov 16  }
  0x16   :  { %41 = dma.hbm_to_vmem [thread:$0]  %s1534_s1, 1024, %s36_s12, [#allocation7], %s1378_s20, %s1378_s20, %s1379_s21  }
  0x17   :  { %s1380_s24 = smov [#allocation3]   ;;  %s1381_s26 = smov [#allocation8]  }
  0x18   :  { %s26_s25 = sshll.u32 %s1380_s24, 4  ;;  %s49_s27 = sshll.u32 %s1381_s26, 4  ;;  %s27_s25 = int_to_ptr.vmem [resolvable:$true] %s26_s25  ;;  %s50_s27 = int_to_ptr.vmem [resolvable:$true] %s49_s27 }
  0x19   :  { %s1281_s30 = scalar_lea.hbm %s1533_s0, 128 }
  0x1a   :  { %p1282_p8 = scmp.ne.s32.totalorder %s1533_s0, %s1281_s30  ;;  %p1285_p9 = scmp.lt.u32.totalorder %s1281_s30, %s1533_s0 }
  0x1c   :  { %p1287_p10 = pnand %p1285_p9, %p1282_p8 }
  0x1e   :  { %1290 = shalt.err (!%p1287_p10)
}
  0x1f   :  { %s1291_s1 = scalar_lea.vmem %s27_s25, 128  ;;  %p1296_p12 = scmp.lt.s32.totalorder %s27_s25, %s27_s25 }
  0x20   :  { %p1292_p11 = scmp.ne.s32.totalorder %s27_s25, %s1291_s1  ;;  %p1297_p13 = scmp.lt.s32.totalorder %s1291_s1, %s1291_s1 }
  0x22   :  { %p1298_p0 = por %p1297_p13, %p1296_p12 }
  0x24   :  { %p1299_p1 = pnand %p1298_p0, %p1292_p11 }
  0x26   :  { %1302 = shalt.err (!%p1299_p1)
}
  0x27   :  { %29 = dma.hbm_to_vmem [thread:$0]  %s1533_s0, 128, %s27_s25, [#allocation4]  }
  0x28   :  { %s1303_s18 = scalar_lea.hbm %s1536_s3, 8192 }
  0x29   :  { %p1304_p2 = scmp.ne.s32.totalorder %s1536_s3, %s1303_s18  ;;  %p1307_p3 = scmp.lt.u32.totalorder %s1303_s18, %s1536_s3 }
  0x2b   :  { %p1309_p4 = pnand %p1307_p3, %p1304_p2 }
  0x2d   :  { %1312 = shalt.err (!%p1309_p4)
}
  0x2e   :  { %s1313_s22 = scalar_lea.vmem %s50_s27, 8192  ;;  %p1318_p6 = scmp.lt.s32.totalorder %s50_s27, %s50_s27 }
  0x2f   :  { %p1314_p5 = scmp.ne.s32.totalorder %s50_s27, %s1313_s22  ;;  %p1319_p7 = scmp.lt.s32.totalorder %s1313_s22, %s1313_s22 }
  0x31   :  { %p1320_p8 = por %p1319_p7, %p1318_p6 }
  0x33   :  { %p1321_p9 = pnand %p1320_p8, %p1314_p5 }
  0x35   :  { %1324 = shalt.err (!%p1321_p9)
}
  0x36   :  { %s1382_s0 = smov 128   ;;  %s1383_s23 = smov 8  }
  0x37   :  { %55 = dma.hbm_to_vmem [thread:$0]  %s1536_s3, 8192, %s50_s27, [#allocation7], %s1382_s0, %s1382_s0, %s1383_s23  }
  0x38   :  { %s1384_s26 = smov [#allocation9]   ;;  %s1325_s10 = scalar_lea.hbm %s1538_s5, 2048 }
  0x39   :  { %s63_s28 = sshll.u32 %s1384_s26, 4  ;;  %p1326_p10 = scmp.ne.s32.totalorder %s1538_s5, %s1325_s10  ;;  %s64_s28 = int_to_ptr.vmem [resolvable:$true] %s63_s28 }
  0x3a   :  { %p1329_p11 = scmp.lt.u32.totalorder %s1325_s10, %s1538_s5 }
  0x3c   :  { %p1331_p12 = pnand %p1329_p11, %p1326_p10 }
  0x3e   :  { %1334 = shalt.err (!%p1331_p12)
}
  0x3f   :  { %s1335_s12 = scalar_lea.vmem %s64_s28, 2048  ;;  %p1340_p0 = scmp.lt.s32.totalorder %s64_s28, %s64_s28 }
  0x40   :  { %p1336_p13 = scmp.ne.s32.totalorder %s64_s28, %s1335_s12  ;;  %p1341_p1 = scmp.lt.s32.totalorder %s1335_s12, %s1335_s12 }
  0x42   :  { %p1342_p2 = por %p1341_p1, %p1340_p0 }
  0x44   :  { %p1343_p3 = pnand %p1342_p2, %p1336_p13 }
  0x46   :  { %1346 = shalt.err (!%p1343_p3)
}
  0x47   :  { %s1385_s3 = smov 64   ;;  %s1386_s27 = smov 4  }
  0x48   :  { %69 = dma.hbm_to_vmem [thread:$0]  %s1538_s5, 2048, %s64_s28, [#allocation10], %s1385_s3, %s1385_s3, %s1386_s27  }
  0x49   :  { %1369 = dma.done.wait [#allocation4], 128  }
  0x4a   :  { %1370 = vsyncadd [#allocation4], 4294967168 }
  0x4b   :  { %1371 = dma.done.wait [#allocation7], 9216  }
  0x4c   :  { %1372 = vsyncadd [#allocation7], 4294958080 }
  0x4d   :  { %1373 = dma.done.wait [#allocation10], 2048  }
  0x4e   :  { %1374 = vsyncadd [#allocation10], 4294965248  ;;  %v1387_v1 = vmov 0   ;;  %v1131_v2 = vld [vmem:[#allocation6 + $0x4] ss:$16 sps:$4 sm:$0xff]   ;;  %v89_v6 = vld [vmem:[#allocation3] sm:$0xff] }
  0x4f   :  { %197 = vmatprep.mubr.bf16.mxu0 %v1387_v1  ;;  %1130 = vset.pattern.permute.xlu0 %v1387_v1  ;;  %v1133_v3 = vld [vmem:[#allocation6] ss:$16 sps:$4 sm:$0xff]   ;;  %v1134_v4 = vld [vmem:[#allocation6 + $0x24] ss:$16 sps:$4 sm:$0xff]   ;;  %v1139_v7 = vld [vmem:[#allocation6 + $0xc] ss:$16 sps:$4 sm:$0xff]   ;;  %v90_v9 = vpack.c.bf16 %v89_v6, %v89_v6 }
  0x50   :  { %165 = vmatprep.subr.bf16.mxu0 %v1131_v2  ;;  %v1136_v5 = vld [vmem:[#allocation6 + $0x20] ss:$16 sps:$4 sm:$0xff]   ;;  %v1137_v8 = vld [vmem:[#allocation6 + $0x8] ss:$16 sps:$4 sm:$0xff]   ;;  %v1143_v10 = vld [vmem:[#allocation8 + $0x4] ss:$8 sps:$4 sm:$0xff]  }
  0x51   :  { %166 = vmatpush1.bf16.msra.mxu0 %v1133_v3  ;;  %v1145_v11 = vld [vmem:[#allocation8] ss:$8 sps:$4 sm:$0xff]   ;;  %vm161_vm0 = vcmask 261120   ;;  %v1146_v12 = vld [vmem:[#allocation8 + $0x14] ss:$8 sps:$4 sm:$0xff]   ;;  %651 = vmatprep.subr.bf16.mxu1 %v1143_v10  ;;  %vm1389_vm1 = vmmov 0  }
  0x52   :  { %167 = vmatprep.subr.bf16.mxu0 %v1134_v4  ;;  %v1142_v13 = vld [vmem:[#allocation6 + $0x2c] ss:$16 sps:$4 sm:$0xff]   ;;  %652 = vmatpush1.bf16.msra.mxu1 %v1145_v11  ;;  %v1148_v14 = vld [vmem:[#allocation8 + $0x10] ss:$8 sps:$4 sm:$0xff]   ;;  %v1154_v18 = vld [vmem:[#allocation8 + $0x20] ss:$8 sps:$4 sm:$0xff]  }
  0x53   :  { %653 = vmatprep.subr.bf16.mxu1 %v1146_v12  ;;  %v1149_v15 = vld [vmem:[#allocation8 + $0x24] ss:$8 sps:$4 sm:$0xff]   ;;  %v1140_v16 = vld [vmem:[#allocation6 + $0x28] ss:$16 sps:$4 sm:$0xff]   ;;  %v1155_v19 = vld [vmem:[#allocation8 + $0x34] ss:$8 sps:$4 sm:$0xff]  }
  0x54   :  { %v1153_v17 = vld [vmem:[#allocation8 + $0x104] ss:$8 sps:$4 sm:$0xff]   ;;  %v1151_v20 = vld [vmem:[#allocation8 + $0x100] ss:$8 sps:$4 sm:$0xff]   ;;  %v1159_v21 = vld [vmem:[#allocation8 + $0x114] ss:$8 sps:$4 sm:$0xff]  }
  0x55   :  { %168 = vmatpush1.bf16.msra.mxu0 %v1136_v5  ;;  %v1160_v22 = vld [vmem:[#allocation8 + $0x30] ss:$8 sps:$4 sm:$0xff]   ;;  %v1161_v23 = vld [vmem:[#allocation8 + $0x44] ss:$8 sps:$4 sm:$0xff]   ;;  %v1166_v26 = vld [vmem:[#allocation8 + $0x40] ss:$8 sps:$4 sm:$0xff]  }
  0x56   :  { %206 = vmatprep.subr.bf16.mxu0 %v1139_v7  ;;  %654 = vmatpush1.bf16.msra.mxu1 %v1148_v14  ;;  %v1157_v24 = vld [vmem:[#allocation8 + $0x110] ss:$8 sps:$4 sm:$0xff]   ;;  %v1165_v25 = vld [vmem:[#allocation8 + $0x124] ss:$8 sps:$4 sm:$0xff]   ;;  %v1167_v27 = vld [vmem:[#allocation8 + $0x54] ss:$8 sps:$4 sm:$0xff]  }
  0x57   :  { %655 = vmatprep.subr.bf16.mxu1 %v1149_v15  ;;  %v1163_v28 = vld [vmem:[#allocation8 + $0x120] ss:$8 sps:$4 sm:$0xff]   ;;  %v1171_v29 = vld [vmem:[#allocation8 + $0x134] ss:$8 sps:$4 sm:$0xff]   ;;  %v1172_v30 = vld [vmem:[#allocation8 + $0x50] ss:$8 sps:$4 sm:$0xff]  }
  0x58   :  { %998 = vmatmul.mubr.msk.bf16.vlgmr.msra.gmra.mrb[0].mxu0 %vm161_vm0, %v90_v9  ;;  %v1173_v31 = vld [vmem:[#allocation8 + $0x64] ss:$8 sps:$4 sm:$0xff]   ;;  %v1169_v32 = vld [vmem:[#allocation8 + $0x130] ss:$8 sps:$4 sm:$0xff]   ;;  %v1178_v34 = vld [vmem:[#allocation8 + $0x60] ss:$8 sps:$4 sm:$0xff]  }
  0x59   :  { %207 = vmatpush1.bf16.msra.mxu0 %v1137_v8  ;;  %238 = vmatprep.mubr.bf16.mxu0 %v1387_v1  ;;  %v1177_v33 = vld [vmem:[#allocation8 + $0x144] ss:$8 sps:$4 sm:$0xff]   ;;  %v1179_v35 = vld [vmem:[#allocation8 + $0x74] ss:$8 sps:$4 sm:$0xff]   ;;  %v1175_v36 = vld [vmem:[#allocation8 + $0x140] ss:$8 sps:$4 sm:$0xff]  }
  0x5a   :  { %208 = vmatprep.subr.bf16.mxu0 %v1142_v13  ;;  %656 = vmatpush1.bf16.msra.mxu1 %v1154_v18  ;;  %v1183_v37 = vld [vmem:[#allocation8 + $0x154] ss:$8 sps:$4 sm:$0xff]   ;;  %v1184_v38 = vld [vmem:[#allocation8 + $0x70] ss:$8 sps:$4 sm:$0xff]   ;;  %v1185_v39 = vld [vmem:[#allocation8 + $0x84] ss:$8 sps:$4 sm:$0xff]   ;;  %v101_v13 = vlaneseq }
  0x5b   :  { %657 = vmatprep.subr.bf16.mxu1 %v1155_v19  ;;  %v1181_v40 = vld [vmem:[#allocation8 + $0x150] ss:$8 sps:$4 sm:$0xff]   ;;  %v1189_v41 = vld [vmem:[#allocation8 + $0x164] ss:$8 sps:$4 sm:$0xff]   ;;  %v1190_v42 = vld [vmem:[#allocation8 + $0x80] ss:$8 sps:$4 sm:$0xff]  }
  0x5c   :  { %v1191_v43 = vld [vmem:[#allocation8 + $0x94] ss:$8 sps:$4 sm:$0xff]   ;;  %v1187_v44 = vld [vmem:[#allocation8 + $0x160] ss:$8 sps:$4 sm:$0xff]   ;;  %v1196_v46 = vld [vmem:[#allocation8 + $0x90] ss:$8 sps:$4 sm:$0xff]  }
  0x5d   :  { %209 = vmatpush1.bf16.msra.mxu0 %v1140_v16  ;;  %v1195_v45 = vld [vmem:[#allocation8 + $0x174] ss:$8 sps:$4 sm:$0xff]   ;;  %v1197_v47 = vld [vmem:[#allocation8 + $0xa4] ss:$8 sps:$4 sm:$0xff]   ;;  %v1193_v48 = vld [vmem:[#allocation8 + $0x170] ss:$8 sps:$4 sm:$0xff]  }
  0x5e   :  { %692 = vmatprep.subr.bf16.mxu0 %v1153_v17  ;;  %658 = vmatpush1.bf16.msra.mxu1 %v1160_v22  ;;  %v1201_v49 = vld [vmem:[#allocation8 + $0x184] ss:$8 sps:$4 sm:$0xff]   ;;  %v1202_v50 = vld [vmem:[#allocation8 + $0xa0] ss:$8 sps:$4 sm:$0xff]   ;;  %v1203_v51 = vld [vmem:[#allocation8 + $0xb4] ss:$8 sps:$4 sm:$0xff]  }
  0x5f   :  { %659 = vmatprep.subr.bf16.mxu1 %v1161_v23  ;;  %v1199_v52 = vld [vmem:[#allocation8 + $0x180] ss:$8 sps:$4 sm:$0xff]   ;;  %v1207_v53 = vld [vmem:[#allocation8 + $0x194] ss:$8 sps:$4 sm:$0xff]   ;;  %v1208_v54 = vld [vmem:[#allocation8 + $0xb0] ss:$8 sps:$4 sm:$0xff]  }
  0x60   :  { %999 = vmatmul.mubr.msk.bf16.vlgmr.msra.gmra.mrb[4].mxu0 %vm161_vm0, %v90_v9  ;;  %v1209_v55 = vld [vmem:[#allocation8 + $0xc4] ss:$8 sps:$4 sm:$0xff]   ;;  %v1205_v56 = vld [vmem:[#allocation8 + $0x190] ss:$8 sps:$4 sm:$0xff]   ;;  %v1214_v58 = vld [vmem:[#allocation8 + $0xc0] ss:$8 sps:$4 sm:$0xff]  }
  0x61   :  { %693 = vmatpush1.bf16.msra.mxu0 %v1151_v20  ;;  %v1213_v57 = vld [vmem:[#allocation8 + $0x1a4] ss:$8 sps:$4 sm:$0xff]   ;;  %v1215_v59 = vld [vmem:[#allocation8 + $0xd4] ss:$8 sps:$4 sm:$0xff]   ;;  %v1211_v60 = vld [vmem:[#allocation8 + $0x1a0] ss:$8 sps:$4 sm:$0xff]  }
  0x62   :  { %694 = vmatprep.subr.bf16.mxu0 %v1159_v21  ;;  %660 = vmatpush1.bf16.msra.mxu1 %v1166_v26  ;;  %v1219_v61 = vld [vmem:[#allocation8 + $0x1b4] ss:$8 sps:$4 sm:$0xff]   ;;  %v1220_v62 = vld [vmem:[#allocation8 + $0xd0] ss:$8 sps:$4 sm:$0xff]   ;;  %v1221_v0 = vld [vmem:[#allocation8 + $0xe4] ss:$8 sps:$4 sm:$0xff]  }
  0x63   :  { %661 = vmatprep.subr.bf16.mxu1 %v1167_v27  ;;  %v1217_v63 = vld [vmem:[#allocation8 + $0x1b0] ss:$8 sps:$4 sm:$0xff]   ;;  %v1225_v1 = vld [vmem:[#allocation8 + $0x1c4] ss:$8 sps:$4 sm:$0xff]   ;;  %v1223_v2 = vld [vmem:[#allocation8 + $0x1c0] ss:$8 sps:$4 sm:$0xff]  }
  0x64   :  { %v1226_v3 = vld [vmem:[#allocation8 + $0xe0] ss:$8 sps:$4 sm:$0xff]   ;;  %v1227_v4 = vld [vmem:[#allocation8 + $0xf4] ss:$8 sps:$4 sm:$0xff]   ;;  %v1229_v6 = vld [vmem:[#allocation8 + $0x1d0] ss:$8 sps:$4 sm:$0xff]  }
  0x65   :  { %695 = vmatpush1.bf16.msra.mxu0 %v1157_v24  ;;  %v1231_v5 = vld [vmem:[#allocation8 + $0x1d4] ss:$8 sps:$4 sm:$0xff]   ;;  %v1232_v7 = vld [vmem:[#allocation8 + $0xf0] ss:$8 sps:$4 sm:$0xff]   ;;  %v1235_v8 = vld [vmem:[#allocation8 + $0x1e4] ss:$8 sps:$4 sm:$0xff]  }
  0x66   :  { %696 = vmatprep.subr.bf16.mxu0 %v1165_v25  ;;  %662 = vmatpush1.bf16.msra.mxu1 %v1172_v30  ;;  %v1233_v9 = vld [vmem:[#allocation8 + $0x1e0] ss:$8 sps:$4 sm:$0xff]   ;;  %v1238_v10 = vld [vmem:[#allocation8 + $0x1f4] ss:$8 sps:$4 sm:$0xff]   ;;  %v1236_v11 = vld [vmem:[#allocation8 + $0x1f0] ss:$8 sps:$4 sm:$0xff]  }
  0x67   :  { %663 = vmatprep.subr.bf16.mxu1 %v1173_v31  ;;  %v1239_v12 = vld [vmem:[#allocation9 + $0x40] sm:$0xff]   ;;  %v1494_v14 = vshrl.u32 %v101_v13, 7  ;;  %v99_v16 = vld [vmem:[%s1535_s2] sm:$0xf]  ;;  %vm971_vm2 = vcmask 57344  }
  0x69   :  { %697 = vmatpush1.bf16.msra.mxu0 %v1163_v28  ;;  %v1497_v15 = vsub.s32 0, %v1494_v14  ;;  %v107_v17 = vsub.s32 1, %v1494_v14  ;;  %v111_v23 = vsub.s32 2, %v1494_v14  ;;  %v115_v26 = vsub.s32 3, %v1494_v14  ;;  %v915_v14 = vld [vmem:[#allocation2] sm:$0x1] }
  0x6a   :  { %698 = vmatprep.subr.bf16.mxu0 %v1171_v29  ;;  %664 = vmatpush1.bf16.msra.mxu1 %v1178_v34 }
  0x6b   :  { %665 = vmatprep.subr.bf16.mxu1 %v1179_v35  ;;  %v104_v18 = vrot.slane %v99_v16, %v1497_v15  ;;  %v108_v19 = vrot.slane %v99_v16, %v107_v17  ;;  %v112_v30 = vrot.slane %v99_v16, %v111_v23  ;;  %v1241_v35 = vld [vmem:[#allocation9 + $0x48] sm:$0xff]   ;;  %918 = vperm.xlu0 %1130, %v915_v14  }
  0x6d   :  { %699 = vmatpush1.bf16.msra.mxu0 %v1169_v32  ;;  %v116_v32 = vrot.slane %v99_v16, %v115_v26  ;;  %v1388_v16 = vmov 0.0   ;;  %v913_v26 = vld [vmem:[%s1540_s7] sm:$0x1] }
  0x6e   :  { %700 = vmatprep.subr.bf16.mxu0 %v1177_v33  ;;  %666 = vmatpush1.bf16.msra.mxu1 %v1184_v38  ;;  %v1240_v33 = vld [vmem:[#allocation9] sm:$0xff]  }
  0x6f   :  { %667 = vmatprep.subr.bf16.mxu1 %v1185_v39 }
  0x71   :  { %701 = vmatpush1.bf16.msra.mxu0 %v1175_v36 }
  0x72   :  { %702 = vmatprep.subr.bf16.mxu0 %v1183_v37  ;;  %668 = vmatpush1.bf16.msra.mxu1 %v1190_v42 }
  0x73   :  { %669 = vmatprep.subr.bf16.mxu1 %v1191_v43 }
  0x75   :  { %703 = vmatpush1.bf16.msra.mxu0 %v1181_v40 }
  0x76   :  { %704 = vmatprep.subr.bf16.mxu0 %v1189_v41  ;;  %670 = vmatpush1.bf16.msra.mxu1 %v1196_v46  ;;  %v1242_v41 = vld [vmem:[#allocation9 + $0x8] sm:$0xff]  }
  0x77   :  { %671 = vmatprep.subr.bf16.mxu1 %v1197_v47  ;;  %v1244_v47 = vld [vmem:[#allocation9 + $0x10] sm:$0xff]  }
  0x79   :  { %705 = vmatpush1.bf16.msra.mxu0 %v1187_v44  ;;  %v1243_v44 = vld [vmem:[#allocation9 + $0x50] sm:$0xff]  }
  0x7a   :  { %706 = vmatprep.subr.bf16.mxu0 %v1195_v45  ;;  %672 = vmatpush1.bf16.msra.mxu1 %v1202_v50  ;;  %v1246_v50 = vld [vmem:[#allocation9 + $0x18] sm:$0xff]  }
  0x7b   :  { %673 = vmatprep.subr.bf16.mxu1 %v1203_v51  ;;  %v1247_v51 = vld [vmem:[#allocation9 + $0x60] sm:$0xff]  }
  0x7d   :  { %707 = vmatpush1.bf16.msra.mxu0 %v1193_v48 }
  0x7e   :  { %708 = vmatprep.subr.bf16.mxu0 %v1201_v49  ;;  %674 = vmatpush1.bf16.msra.mxu1 %v1208_v54  ;;  %v1245_v49 = vld [vmem:[#allocation9 + $0x58] sm:$0xff]   ;;  %v1250_v54 = vld [vmem:[#allocation9 + $0x28] sm:$0xff]  }
  0x7f   :  { %675 = vmatprep.subr.bf16.mxu1 %v1209_v55  ;;  %v1251_v55 = vld [vmem:[#allocation9 + $0x70] sm:$0xff]  }
  0x81   :  { %709 = vmatpush1.bf16.msra.mxu0 %v1199_v52  ;;  %v1248_v52 = vld [vmem:[#allocation9 + $0x20] sm:$0xff]  }
  0x82   :  { %710 = vmatprep.subr.bf16.mxu0 %v1207_v53  ;;  %676 = vmatpush1.bf16.msra.mxu1 %v1214_v58  ;;  %v1249_v53 = vld [vmem:[#allocation9 + $0x68] sm:$0xff]   ;;  %v1254_v58 = vld [vmem:[#allocation9 + $0x38] sm:$0xff]  }
  0x83   :  { %677 = vmatprep.subr.bf16.mxu1 %v1215_v59  ;;  %v319_v59 = vld [vmem:[%s1537_s4] sm:$0x3] }
  0x85   :  { %711 = vmatpush1.bf16.msra.mxu0 %v1205_v56  ;;  %v1252_v56 = vld [vmem:[#allocation9 + $0x30] sm:$0xff]  }
  0x86   :  { %712 = vmatprep.subr.bf16.mxu0 %v1213_v57  ;;  %678 = vmatpush1.bf16.msra.mxu1 %v1220_v62  ;;  %v1253_v57 = vld [vmem:[#allocation9 + $0x78] sm:$0xff]  }
  0x87   :  { %679 = vmatprep.subr.bf16.mxu1 %v1221_v0 }
  0x89   :  { %713 = vmatpush1.bf16.msra.mxu0 %v1211_v60 }
  0x8a   :  { %714 = vmatprep.subr.bf16.mxu0 %v1219_v61  ;;  %680 = vmatpush1.bf16.msra.mxu1 %v1226_v3 }
  0x8b   :  { %681 = vmatprep.subr.bf16.mxu1 %v1227_v4 }
  0x8d   :  { %715 = vmatpush1.bf16.msra.mxu0 %v1217_v63  ;;  %v324_v63 = vrot.slane %v319_v59, %v1497_v15 }
  0x8e   :  { %716 = vmatprep.subr.bf16.mxu0 %v1225_v1  ;;  %682 = vmatpush1.bf16.msra.mxu1 %v1232_v7  ;;  %v328_v1 = vrot.slane %v319_v59, %v107_v17 }
  0x8f   :  { %1082 = vmatprep.subr.bf16.mxu1 %v1239_v12 }
  0x91   :  { %717 = vmatpush1.bf16.msra.mxu0 %v1223_v2 }
  0x92   :  { %718 = vmatprep.subr.bf16.mxu0 %v1231_v5 }
  0x95   :  { %719 = vmatpush1.bf16.msra.mxu0 %v1229_v6 }
  0x96   :  { %720 = vmatprep.subr.bf16.mxu0 %v1235_v8 }
  0x99   :  { %721 = vmatpush1.bf16.msra.mxu0 %v1233_v9 }
  0x9a   :  { %722 = vmatprep.subr.bf16.mxu0 %v1238_v10 }
  0x9d   :  { %723 = vmatpush1.bf16.msra.mxu0 %v1236_v11 }
  0x9e   :  { %1106 = vmatprep.subr.bf16.mxu0 %v1388_v16 }
 0x12b   :  { %v199_v20 = vpop.f32.mrb[0].mxu0 }
 0x12c   :  { %v200_v21 = vadd.f32 %v199_v20, %v104_v18  ;;  %v201_v22 = vpop.f32.mrb[1].mxu0  ;;  %v1064_v18 = vld [vmem:[%s1539_s6] ss:$0 sm:$0xff]  ;;  %s1390_s6 = smov [#allocation11]  }
 0x12d   :  { %v202_v24 = vadd.f32 %v201_v22, %v108_v19  ;;  %v203_v25 = vpop.f32.mrb[2].mxu0  ;;  %s979_s21 = sshll.u32 %s1390_s6, 4  ;;  %s980_s21 = int_to_ptr.vmem [resolvable:$true] %s979_s21 }
 0x12e   :  { %v247_v27 = vmax.f32 %v200_v21, 0.0  ;;  %v204_v28 = vpop.f32.mrb[3].mxu0  ;;  %s1347_s7 = scalar_lea.vmem %s980_s21, 16  ;;  %s1351_s22 = scalar_lea.vmem %s980_s21, 32 }
 0x12f   :  { %v248_v29 = vmax.f32 %v202_v24, 0.0  ;;  %p1348_p4 = scmp.ne.s32.totalorder %s980_s21, %s1347_s7  ;;  %p1352_p5 = scmp.lt.s32.totalorder %s980_s21, %s980_s21 }
 0x130   :  { %v251_v34 = vpack.c.bf16 %v247_v27, %v247_v27  ;;  %v919_v27 = vpop.permute.xlu0 %918  ;;  %p1353_p6 = scmp.lt.s32.totalorder %s1351_s22, %s1347_s7 }
 0x131   :  { %v252_v31 = vpack.c.bf16 %v248_v29, %v248_v29  ;;  %v924_v28 = vrot.slane %v919_v27, %v1497_v15 }
 0x132   :  { %p1354_p7 = por %p1353_p6, %p1352_p5 }
 0x133   :  { %v240_v36 = vpop.f32.mrb[4].mxu0  ;;  %683 = vmatprep.mubr.bf16.mxu1 %v252_v31 }
 0x134   :  { %v241_v37 = vadd.f32 %v240_v36, %v112_v30  ;;  %v242_v38 = vpop.f32.mrb[5].mxu0  ;;  %684 = vmatmul.mubr.bf16.vlgmr.msra.gmra.mrb[0].mxu1 %v251_v34  ;;  %p1355_p8 = pnand %p1354_p7, %p1348_p4 }
 0x135   :  { %v243_v39 = vadd.f32 %v242_v38, %v116_v32  ;;  %v244_v40 = vpop.f32.mrb[6].mxu0  ;;  %1083 = vmatpush3.bf16.msra.mxu1 %v1240_v33 }
 0x136   :  { %v249_v42 = vmax.f32 %v241_v37, 0.0  ;;  %v245_v43 = vpop.f32.mrb[7].mxu0  ;;  %1084 = vmatprep.subr.bf16.mxu1 %v1241_v35 }
 0x137   :  { %v250_v45 = vmax.f32 %v243_v39, 0.0 }
 0x138   :  { %v253_v48 = vpack.c.bf16 %v249_v42, %v249_v42 }
 0x139   :  { %v254_v46 = vpack.c.bf16 %v250_v45, %v250_v45  ;;  %1085 = vmatpush3.bf16.msra.mxu1 %v1242_v41 }
 0x13a   :  { %1086 = vmatprep.subr.bf16.mxu1 %v1243_v44 }
 0x13b   :  { %724 = vmatprep.mubr.bf16.mxu0 %v254_v46 }
 0x13c   :  { %725 = vmatmul.mubr.bf16.vlgmr.msra.gmra.mrb[8].mxu0 %v253_v48 }
 0x13d   :  { %1087 = vmatpush3.bf16.msra.mxu1 %v1244_v47  ;;  %1108 = vmatprep.mubr.msk.bf16.mxu0 %vm1389_vm1, %v1388_v16 }
 0x13e   :  { %1088 = vmatprep.subr.bf16.mxu1 %v1245_v49 }
 0x141   :  { %1089 = vmatpush3.bf16.msra.mxu1 %v1246_v50 }
 0x142   :  { %1090 = vmatprep.subr.bf16.mxu1 %v1247_v51 }
 0x145   :  { %1091 = vmatpush3.bf16.msra.mxu1 %v1248_v52 }
 0x146   :  { %1092 = vmatprep.subr.bf16.mxu1 %v1249_v53 }
 0x149   :  { %1093 = vmatpush3.bf16.msra.mxu1 %v1250_v54 }
 0x14a   :  { %1094 = vmatprep.subr.bf16.mxu1 %v1251_v55 }
 0x14d   :  { %1095 = vmatpush3.bf16.msra.mxu1 %v1252_v56 }
 0x14e   :  { %1096 = vmatprep.subr.bf16.mxu1 %v1253_v57 }
 0x151   :  { %1097 = vmatpush3.bf16.msra.mxu1 %v1254_v58 }
 0x207   :  { %v685_v60 = vpop.f32.mrb[0].mxu1 }
 0x208   :  { %v687_v61 = vpop.f32.mrb[1].mxu1  ;;  %v686_v2 = vadd.f32 %v685_v60, %v324_v63 }
 0x209   :  { %v689_v62 = vpop.f32.mrb[2].mxu1  ;;  %v688_v3 = vadd.f32 %v687_v61, %v328_v1 }
 0x20a   :  { %v690_v0 = vpop.f32.mrb[3].mxu1 }
 0x20f   :  { %v726_v4 = vpop.f32.mrb[8].mxu0 }
 0x210   :  { %v727_v5 = vadd.f32 %v726_v4, %v686_v2  ;;  %v728_v6 = vpop.f32.mrb[9].mxu0 }
 0x211   :  { %v729_v7 = vadd.f32 %v728_v6, %v688_v3  ;;  %v730_v8 = vpop.f32.mrb[10].mxu0 }
 0x212   :  { %v733_v9 = vmax.f32 %v727_v5, 0.0  ;;  %v731_v10 = vpop.f32.mrb[11].mxu0 }
 0x213   :  { %v734_v11 = vmax.f32 %v729_v7, 0.0 }
 0x214   :  { %v735_v13 = vpack.c.bf16 %v733_v9, %v733_v9 }
 0x215   :  { %v736_v12 = vpack.c.bf16 %v734_v11, %v734_v11 }
 0x217   :  { %904 = vmatprep.mubr.bf16.mxu1 %v736_v12 }
 0x218   :  { %905 = vmatmul.mubr.bf16.vlgmr.msra.gmra.mrb[4].mxu1 %v735_v13 }
 0x2eb   :  { %v1098_v17 = vpop.f32.mrb[4].mxu1 }
 0x2ec   :  { %v1099_v19 = vpop.f32.mrb[5].mxu1 }
 0x2ed   :  { %v1100_v20 = vadd.f32 %v1099_v19, %v1098_v17  ;;  %v1101_v21 = vpop.f32.mrb[6].mxu1 }
 0x2ee   :  { %v1102_v22 = vpop.f32.mrb[7].mxu1 }
 0x2ef   :  { %v907_v23 = vadd.f32 %v1100_v20, %v1064_v18 }
 0x2f1   :  { %v912_v24 = vmax.f32 %v907_v23, 0.0 }
 0x2f3   :  { %v914_v25 = vpack.c.bf16 %v912_v24, %v912_v24 }
 0x2f5   :  { %1107 = vmatpush3.bf16.xpose.msra.mxu0 %v914_v25 }
 0x2fc   :  { %1109 = vmatmul.mubr.bf16.vlgmr.msra.gmra.mrb[12].mxu0 %v913_v26 }
 0x3cf   :  { %v959_v29 = vpop.f32.mrb[12].mxu0 }
 0x3d0   :  { %v960_v30 = vadd.f32 %v959_v29, %v924_v28  ;;  %v1110_v31 = vpop.f32.mrb[13].mxu0 }
 0x3d1   :  { %v962_v32 = vpop.f32.mrb[14].mxu0 }
 0x3d2   :  { %v1081_v33 = vmul.f32 -1.442695, %v960_v30  ;;  %v1111_v34 = vpop.f32.mrb[15].mxu0 }
 0x3d4   :  { %1255 = vpow2.f32 %v1081_v33 }
 0x3de   :  { %v1256_v35 = vpop.eup %1255 }
 0x3df   :  { %v968_v36 = vadd.f32 1.0, %v1256_v35 }
 0x3e1   :  { %1257 = vrcp.f32 %v968_v36 }
 0x3eb   :  { %v1258_v37 = vpop.eup %1257 }
 0x3ec   :  { %972 = vst.msk [vmem:[#allocation11] sm:$0x1] %vm971_vm2, %v1258_v37 }
 0x3ed   :  { %1358 = shalt.err (!%p1355_p8)
}
 0x3ee   :  { %s1359_s24 = scalar_lea.hbm %s1542_s9, 16 }
 0x3ef   :  { %p1360_p9 = scmp.ne.s32.totalorder %s1542_s9, %s1359_s24  ;;  %p1363_p10 = scmp.lt.u32.totalorder %s1359_s24, %s1542_s9 }
 0x3f1   :  { %p1365_p11 = pnand %p1363_p10, %p1360_p9 }
 0x3f3   :  { %1368 = shalt.err (!%p1365_p11)
}
 0x3f4   :  { %982 = dma.vmem_to_hbm [thread:$0]  %s980_s21, 16, %s1542_s9, [#allocation5]  }
 0x3f5   :  { %1375 = dma.done.wait [#allocation5], 16  }
 0x3f6   :  { %1376 = vsyncadd [#allocation5], 4294967280 }
 0x3f7   :  { %986 = vsyncpa [#allocation4], 1 }
 0x3f8   :  { %987 = vsyncpa [#allocation7], 1 }
 0x3f9   :  { %988 = vsyncpa [#allocation10], 1 }
 0x3fa   :  { %989 = vsyncpa [#allocation5], 1 }

</bundles_post_ra>
